<compile_context>
chip_gen: v5e
topology: v5e:2x2
jax: 0.10.0
libtpu: 0.0.40
codegen_flags: <defaults>
</compile_context>

<pallas_src>
import functools
import math

import jax
import jax.numpy as jnp
from jax import lax
from jax.experimental import pallas as pl
from jax.experimental.pallas import tpu as pltpu

_MIB = 1024 * 1024


def _vmem_limit(est_bytes):
    # Explicit scoped-VMEM limit sized to the chosen tiles with 2x headroom,
    # clamped to [32 MiB, 64 MiB]: above the v5e/v6e scoped defaults, below
    # v7x's 64 MiB physical VMEM.
    return int(min(max(2 * est_bytes, 32 * _MIB), 64 * _MIB))


def _pick_tile(n, target, align):
    """Largest `align`-aligned divisor of n that is <= target (else n itself)."""
    if n <= target:
        return n
    t = (target // align) * align
    while t >= align:
        if n % t == 0:
            return t
        t -= align
    return n


# --------------------- fused Q/K/V projection kernel -------------------------
def _qkv_proj_kernel(xq_ref, xk_ref, xv_ref,
                     wq_ref, wk_ref, wv_ref,
                     bq_ref, bk_ref, bv_ref,
                     qo_ref, ko_ref, vo_ref,
                     accq_ref, acck_ref, accv_ref, *, scale):
    # x blocks: (tm, tkk); w blocks: (tn, tkk) in PyTorch (Dout, Din) layout;
    # bias blocks: (1, tn) f32; grid = (M tiles, Dout tiles, Din tiles).
    kk = pl.program_id(2)

    @pl.when(kk == 0)
    def _init():
        accq_ref[...] = jnp.zeros(accq_ref.shape, accq_ref.dtype)
        acck_ref[...] = jnp.zeros(acck_ref.shape, acck_ref.dtype)
        accv_ref[...] = jnp.zeros(accv_ref.shape, accv_ref.dtype)

    cdt = wq_ref.dtype  # compute dtype (bf16 by default), weights pre-cast
    for x_ref, w_ref, acc_ref in ((xq_ref, wq_ref, accq_ref),
                                  (xk_ref, wk_ref, acck_ref),
                                  (xv_ref, wv_ref, accv_ref)):
        # x @ W^T without materializing W^T: contract the last axes of both.
        acc_ref[...] += lax.dot_general(
            x_ref[...].astype(cdt), w_ref[...],
            dimension_numbers=(((1,), (1,)), ((), ())),
            preferred_element_type=jnp.float32)

    @pl.when(kk == pl.num_programs(2) - 1)
    def _finalize():
        # Bias added in f32; 1/sqrt(d_k) folded into the Q projection.
        qo_ref[...] = ((accq_ref[...] + bq_ref[...]) * scale).astype(qo_ref.dtype)
        ko_ref[...] = (acck_ref[...] + bk_ref[...]).astype(ko_ref.dtype)
        vo_ref[...] = (accv_ref[...] + bv_ref[...]).astype(vo_ref.dtype)


# --------------------- flash attention kernel (per batch, head, q-tile) ------
def _flash_attention_kernel(q_ref, k_ref, v_ref, o_ref, m_sc, l_sc, acc_sc):
    # Blocks: q (1, 1, tq, dk), k/v (1, 1, tkv, dk); kv grid axis is innermost.
    ki = pl.program_id(3)

    @pl.when(ki == 0)
    def _init():
        m_sc[...] = jnp.full(m_sc.shape, -jnp.inf, m_sc.dtype)
        l_sc[...] = jnp.zeros(l_sc.shape, l_sc.dtype)
        acc_sc[...] = jnp.zeros(acc_sc.shape, acc_sc.dtype)

    q = q_ref[0, 0]            # (tq, dk); 1/sqrt(dk) already folded in
    k = k_ref[0, 0]            # (tkv, dk)
    v = v_ref[0, 0]            # (tkv, dk)

    # q . k^T by contracting the last axis of both operands (no K transpose).
    s = lax.dot_general(q, k, dimension_numbers=(((1,), (1,)), ((), ())),
                        preferred_element_type=jnp.float32)        # (tq, tkv) f32

    # TODO(synk): mask would be applied here (s = where(mask == 0, -1e4, s)).
    m_prev = m_sc[...]
    m_new = jnp.maximum(m_prev, jnp.max(s, axis=-1, keepdims=True))
    alpha = jnp.exp(m_prev - m_new)
    p = jnp.exp(s - m_new)                                          # f32 softmax
    l_sc[...] = alpha * l_sc[...] + jnp.sum(p, axis=-1, keepdims=True)
    acc_sc[...] = alpha * acc_sc[...] + jnp.dot(
        p.astype(v.dtype), v, preferred_element_type=jnp.float32)
    m_sc[...] = m_new

    @pl.when(ki == pl.num_programs(3) - 1)
    def _finalize():
        # Exact reciprocal (approx=True removed per review: negligible perf,
        # real accuracy cost).
        o_ref[0, 0] = (acc_sc[...] / l_sc[...]).astype(o_ref.dtype)


# ----------------------------- output projection -----------------------------
def _out_proj_kernel(x_ref, w_ref, b_ref, o_ref, acc_ref):
    kk = pl.program_id(2)

    @pl.when(kk == 0)
    def _init():
        acc_ref[...] = jnp.zeros(acc_ref.shape, acc_ref.dtype)

    acc_ref[...] += lax.dot_general(
        x_ref[...].astype(w_ref.dtype), w_ref[...],
        dimension_numbers=(((1,), (1,)), ((), ())),
        preferred_element_type=jnp.float32)

    @pl.when(kk == pl.num_programs(2) - 1)
    def _finalize():
        o_ref[...] = (acc_ref[...] + b_ref[...]).astype(o_ref.dtype)


# ----------------------------- parameter prep (one-time) ---------------------
def prepare_params(params, *, use_bf16=True):
    """Hoisted out of the per-forward path: pre-cast weights to the MXU compute
    dtype (bf16 by default, f32 accumulation stays in-kernel); biases in f32."""
    cdt = jnp.bfloat16 if use_bf16 else jnp.float32
    d = params["wq"].shape[0]
    out = {}
    for name in ("wq", "wk", "wv", "wc"):
        out[name] = params[name].astype(cdt)
    for name in ("bq", "bk", "bv", "bc"):
        out[name] = params[name].reshape(1, d).astype(jnp.float32)
    return out


# ----------------------------- MultiHeadAttention ----------------------------
@functools.partial(jax.jit, static_argnums=(4,))
def multi_head_attention(q, k, v, params, n_head):
    B, S, D = q.shape
    assert D % n_head == 0
    dk = D // n_head
    M = B * S
    x_dt = q.dtype
    cdt = params["wq"].dtype                 # compute dtype chosen at prep time
    cdt_b = jnp.dtype(cdt).itemsize
    x_b = jnp.dtype(x_dt).itemsize
    scale = 1.0 / math.sqrt(dk)

    # ---- glue: zero-cost views ------------------------------------------------
    q2, k2, v2 = q.reshape(M, D), k.reshape(M, D), v.reshape(M, D)

    # ---- tiling (MXU-aligned targets, full dims at toy sizes) -----------------
    tm = _pick_tile(M, 512, 256)              # row tile
    tn = _pick_tile(D, 256, 128)              # Dout tile
    tkk = _pick_tile(D, 512, 128)             # Din (reduction) tile
    gm, gn, gk = M // tm, D // tn, D // tkk

    x_spec = pl.BlockSpec((tm, tkk), lambda i, j, kk: (i, kk))
    w_spec = pl.BlockSpec((tn, tkk), lambda i, j, kk: (j, kk))
    b_spec = pl.BlockSpec((1, tn), lambda i, j, kk: (0, j))
    o_spec = pl.BlockSpec((tm, tn), lambda i, j, kk: (i, j))

    # ---- 1) fused Q/K/V projections (one launch, K-tiled weights) -------------
    proj_vmem = (2 * (3 * tm * tkk * x_b + 3 * tn * tkk * cdt_b
                      + 3 * tn * 4 + 3 * tm * tn * cdt_b)
                 + 3 * tm * tn * 4)
    proj_cost = pl.CostEstimate(
        flops=2 * 3 * M * D * D,
        transcendentals=0,
        bytes_accessed=(3 * M * D * x_b * gn + 3 * D * D * cdt_b * gm
                        + 3 * D * 4 + 3 * M * D * cdt_b))
    qp, kp, vp = pl.pallas_call(
        functools.partial(_qkv_proj_kernel, scale=scale),
        out_shape=tuple(jax.ShapeDtypeStruct((M, D), cdt) for _ in range(3)),
        grid=(gm, gn, gk),
        in_specs=[x_spec, x_spec, x_spec,
                  w_spec, w_spec, w_spec,
                  b_spec, b_spec, b_spec],
        out_specs=(o_spec, o_spec, o_spec),
        scratch_shapes=[pltpu.VMEM((tm, tn), jnp.float32) for _ in range(3)],
        compiler_params=pltpu.CompilerParams(
            dimension_semantics=("parallel", "parallel", "arbitrary"),
            vmem_limit_bytes=_vmem_limit(proj_vmem)),
        cost_estimate=proj_cost,
    )(q2, k2, v2,
      params["wq"], params["wk"], params["wv"],
      params["bq"], params["bk"], params["bv"])

    # ---- glue: split() == torch .view(B, n_head, S, d_k) (free, row-major) ----
    qh = qp.reshape(B, n_head, S, dk)
    kh = kp.reshape(B, n_head, S, dk)
    vh = vp.reshape(B, n_head, S, dk)

    # ---- 2) flash attention: grid (B, H, q_tile, kv_tile), kv last ------------
    tq = _pick_tile(S, 1024, 8)
    tkv = _pick_tile(S, 512, 8)
    n_q, n_kv = S // tq, S // tkv

    q_spec = pl.BlockSpec((1, 1, tq, dk), lambda b, h, qi, ki: (b, h, qi, 0))
    kv_spec = pl.BlockSpec((1, 1, tkv, dk), lambda b, h, qi, ki: (b, h, ki, 0))
    oa_spec = pl.BlockSpec((1, 1, tq, dk), lambda b, h, qi, ki: (b, h, qi, 0))

    attn_vmem = (2 * (2 * tq * dk * cdt_b + 2 * tkv * dk * cdt_b)   # q, out, k, v
                 + tq * dk * 4 + 2 * tq * 4                          # acc, m, l
                 + 2 * tq * tkv * 4)                                 # s, p (f32)
    attn_cost = pl.CostEstimate(
        flops=4 * B * n_head * S * S * dk,
        transcendentals=B * n_head * S * S,
        bytes_accessed=(B * S * D + 2 * n_q * B * S * D + B * S * D) * cdt_b)
    out_h = pl.pallas_call(
        _flash_attention_kernel,
        out_shape=jax.ShapeDtypeStruct((B, n_head, S, dk), cdt),
        grid=(B, n_head, n_q, n_kv),
        in_specs=[q_spec, kv_spec, kv_spec],
        out_specs=oa_spec,
        scratch_shapes=[pltpu.VMEM((tq, 1), jnp.float32),
                        pltpu.VMEM((tq, 1), jnp.float32),
                        pltpu.VMEM((tq, dk), jnp.float32)],
        compiler_params=pltpu.CompilerParams(
            dimension_semantics=("parallel", "parallel", "parallel", "arbitrary"),
            vmem_limit_bytes=_vmem_limit(attn_vmem)),
        cost_estimate=attn_cost,
    )(qh, kh, vh)

    # ---- glue: concat() == torch .view(B, S, d_model) (free, row-major) -------
    out2 = out_h.reshape(M, D)

    # ---- 3) output projection (K-tiled, Dout-tiled, lane-dense output) --------
    oproj_vmem = (2 * (tm * tkk * cdt_b + tn * tkk * cdt_b + tn * 4
                       + tm * tn * x_b)
                  + tm * tn * 4)
    oproj_cost = pl.CostEstimate(
        flops=2 * M * D * D,
        transcendentals=0,
        bytes_accessed=(M * D * cdt_b * gn + D * D * cdt_b * gm
                        + D * 4 + M * D * x_b))
    y = pl.pallas_call(
        _out_proj_kernel,
        out_shape=jax.ShapeDtypeStruct((M, D), x_dt),
        grid=(gm, gn, gk),
        in_specs=[x_spec, w_spec, b_spec],
        out_specs=o_spec,
        scratch_shapes=[pltpu.VMEM((tm, tn), jnp.float32)],
        compiler_params=pltpu.CompilerParams(
            dimension_semantics=("parallel", "parallel", "arbitrary"),
            vmem_limit_bytes=_vmem_limit(oproj_vmem)),
        cost_estimate=oproj_cost,
    )(out2, params["wc"], params["bc"])

    return y.reshape(B, S, D)


# ----------------------------- pure-JAX reference ----------------------------
def _reference(q, k, v, params, n_head):
    def lin(x, w, b):
        return x @ w.T + b
    B, S, D = q.shape
    dk = D // n_head
    qp = lin(q, params["wq"], params["bq"]).reshape(B, n_head, S, dk)
    kp = lin(k, params["wk"], params["bk"]).reshape(B, n_head, S, dk)
    vp = lin(v, params["wv"], params["bv"]).reshape(B, n_head, S, dk)
    scores = jnp.einsum("bhqd,bhkd->bhqk", qp, kp) / math.sqrt(dk)
    p = jax.nn.softmax(scores, axis=-1)
    out = jnp.einsum("bhqk,bhkd->bhqd", p, vp).reshape(B, S, D)
    return lin(out, params["wc"], params["bc"])


# ----------------------------------- main -------------------------------------
if __name__ == "__main__":
    B, S, D, H = 2, 8, 32, 4          # batch=2, seq=8, d_model=32, n_head=4

    key = jax.random.PRNGKey(0)
    keys = jax.random.split(key, 11)
    bound = 1.0 / math.sqrt(D)        # nn.Linear default init range
    raw_params = {
        "wq": jax.random.uniform(keys[0], (D, D), jnp.float32, -bound, bound),
        "bq": jax.random.uniform(keys[1], (D,), jnp.float32, -bound, bound),
        "wk": jax.random.uniform(keys[2], (D, D), jnp.float32, -bound, bound),
        "bk": jax.random.uniform(keys[3], (D,), jnp.float32, -bound, bound),
        "wv": jax.random.uniform(keys[4], (D, D), jnp.float32, -bound, bound),
        "bv": jax.random.uniform(keys[5], (D,), jnp.float32, -bound, bound),
        "wc": jax.random.uniform(keys[6], (D, D), jnp.float32, -bound, bound),
        "bc": jax.random.uniform(keys[7], (D,), jnp.float32, -bound, bound),
    }
    q = jax.random.normal(keys[8], (B, S, D), jnp.float32)
    k = jax.random.normal(keys[9], (B, S, D), jnp.float32)
    v = jax.random.normal(keys[10], (B, S, D), jnp.float32)

    ref = _reference(q, k, v, raw_params, H)

    # Production default: bf16 MXU operands (f32 accumulation + f32 softmax).
    # Tolerance reflects the bf16 operand rounding, not any kernel shortcut
    # (the softmax reciprocal is exact).
    params_bf16 = prepare_params(raw_params, use_bf16=True)
    out = jax.block_until_ready(multi_head_attention(q, k, v, params_bf16, H))
    assert out.shape == (B, S, D)
    assert jnp.allclose(out, ref, atol=3e-2, rtol=3e-2), "bf16 mismatch vs reference"

    # f32 path: remaining tolerance is bounded by the TPU's default f32 matmul
    # precision (shared with the pure-JAX reference), not by kernel
    # approximations -- the approx reciprocal was removed.
    params_f32 = prepare_params(raw_params, use_bf16=False)
    out32 = jax.block_until_ready(multi_head_attention(q, k, v, params_f32, H))
    assert jnp.allclose(out32, ref, atol=1e-2, rtol=1e-2), "f32 mismatch vs reference"

    print("KERNEL_OK")
</pallas_src>

<mosaic_0001>
module attributes {stable_mosaic.version = 11 : i64} {
  func.func @_out_proj_kernel(%arg0: i32, %arg1: i32, %arg2: i32, %arg3: memref<16x32xbf16, #tpu.memory_space<vmem>>, %arg4: memref<32x32xbf16, #tpu.memory_space<vmem>>, %arg5: memref<1x32xf32, #tpu.memory_space<vmem>>, %arg6: memref<16x32xf32, #tpu.memory_space<vmem>>, %arg7: memref<16x32xf32, #tpu.memory_space<vmem>>) attributes {dimension_semantics = [#tpu.dimension_semantics<parallel>, #tpu.dimension_semantics<parallel>, #tpu.dimension_semantics<arbitrary>], iteration_bounds = array<i64: 1, 1, 1>, scalar_prefetch = 0 : i64, scratch_operands = 1 : i64, tpu.core_type = #tpu.core_type<tc>, window_params = [{transform_indices = @transform_0, window_bounds = array<i64: 16, 32>}, {transform_indices = @transform_1, window_bounds = array<i64: 32, 32>}, {transform_indices = @transform_2, window_bounds = array<i64: 1, 32>}, {transform_indices = @transform_3, window_bounds = array<i64: 16, 32>}]} {
    %c0_i32 = arith.constant 0 : i32
    %0 = arith.cmpi eq, %arg2, %c0_i32 : i32
    %1 = arith.extui %0 : i1 to i32
    %c0_i32_0 = arith.constant 0 : i32
    %2 = arith.cmpi ne, %1, %c0_i32_0 : i32
    scf.if %2 {
      %cst_10 = arith.constant 0.000000e+00 : f32
      %12 = vector.broadcast %cst_10 : f32 to vector<16x32xf32>
      %c0_11 = arith.constant 0 : index
      %c0_12 = arith.constant 0 : index
      %13 = vector.load %arg7[%c0_11, %c0_12] : memref<16x32xf32, #tpu.memory_space<vmem>>, vector<16x32xf32>
      tpu.vector_store %arg7[%c0_11, %c0_12], %12 {strides = array<i32>} : memref<16x32xf32, #tpu.memory_space<vmem>>, vector<16x32xf32>,
    } else {
    }
    %c0 = arith.constant 0 : index
    %c0_1 = arith.constant 0 : index
    %3 = vector.load %arg7[%c0, %c0_1] : memref<16x32xf32, #tpu.memory_space<vmem>>, vector<16x32xf32>
    %c0_2 = arith.constant 0 : index
    %c0_3 = arith.constant 0 : index
    %4 = vector.load %arg3[%c0_2, %c0_3] : memref<16x32xbf16, #tpu.memory_space<vmem>>, vector<16x32xbf16>
    %c0_4 = arith.constant 0 : index
    %c0_5 = arith.constant 0 : index
    %5 = vector.load %arg4[%c0_4, %c0_5] : memref<32x32xbf16, #tpu.memory_space<vmem>>, vector<32x32xbf16>
    %cst = arith.constant dense<0.000000e+00> : vector<16x32xf32>
    %6 = tpu.matmul %4, %5, %cst {dimension_numbers = #tpu.dot_dimension_numbers<[1], [1], [0], [0], [0, 0, 1, 0], [], []>} : vector<16x32xbf16>, vector<32x32xbf16>, vector<16x32xf32> -> vector<16x32xf32>
    %7 = arith.addf %3, %6 : vector<16x32xf32>
    %c0_6 = arith.constant 0 : index
    %c0_7 = arith.constant 0 : index
    %8 = vector.load %arg7[%c0_6, %c0_7] : memref<16x32xf32, #tpu.memory_space<vmem>>, vector<16x32xf32>
    tpu.vector_store %arg7[%c0_6, %c0_7], %7 {strides = array<i32>} : memref<16x32xf32, #tpu.memory_space<vmem>>, vector<16x32xf32>,
    %c0_i32_8 = arith.constant 0 : i32
    %9 = arith.cmpi eq, %arg2, %c0_i32_8 : i32
    %10 = arith.extui %9 : i1 to i32
    %c0_i32_9 = arith.constant 0 : i32
    %11 = arith.cmpi ne, %10, %c0_i32_9 : i32
    scf.if %11 {
      %c0_10 = arith.constant 0 : index
      %c0_11 = arith.constant 0 : index
      %12 = vector.load %arg7[%c0_10, %c0_11] : memref<16x32xf32, #tpu.memory_space<vmem>>, vector<16x32xf32>
      %c0_12 = arith.constant 0 : index
      %c0_13 = arith.constant 0 : index
      %13 = vector.load %arg5[%c0_12, %c0_13] : memref<1x32xf32, #tpu.memory_space<vmem>>, vector<1x32xf32>
      %14 = vector.broadcast %13 : vector<1x32xf32> to vector<16x32xf32>
      %15 = arith.addf %12, %14 : vector<16x32xf32>
      %c0_14 = arith.constant 0 : index
      %c0_15 = arith.constant 0 : index
      %16 = vector.load %arg6[%c0_14, %c0_15] : memref<16x32xf32, #tpu.memory_space<vmem>>, vector<16x32xf32>
      tpu.vector_store %arg6[%c0_14, %c0_15], %15 {strides = array<i32>} : memref<16x32xf32, #tpu.memory_space<vmem>>, vector<16x32xf32>,
    } else {
    }
    return
  }
  func.func @transform_0(%arg0: i32, %arg1: i32, %arg2: i32) -> (i32, i32) {
    %c0_i32 = arith.constant 0 : i32
    return %arg0, %arg2 : i32, i32
  }
  func.func @transform_1(%arg0: i32, %arg1: i32, %arg2: i32) -> (i32, i32) {
    %c0_i32 = arith.constant 0 : i32
    return %arg1, %arg2 : i32, i32
  }
  func.func @transform_2(%arg0: i32, %arg1: i32, %arg2: i32) -> (i32, i32) {
    %c0_i32 = arith.constant 0 : i32
    %c0_i32_0 = arith.constant 0 : i32
    return %c0_i32, %arg1 : i32, i32
  }
  func.func @transform_3(%arg0: i32, %arg1: i32, %arg2: i32) -> (i32, i32) {
    %c0_i32 = arith.constant 0 : i32
    return %arg0, %arg1 : i32, i32
  }
}

module attributes {stable_mosaic.version = 11 : i64} {
  func.func @_flash_attention_kernel(%arg0: i32, %arg1: i32, %arg2: i32, %arg3: i32, %arg4: memref<1x1x8x8xbf16, #tpu.memory_space<vmem>>, %arg5: memref<1x1x8x8xbf16, #tpu.memory_space<vmem>>, %arg6: memref<1x1x8x8xbf16, #tpu.memory_space<vmem>>, %arg7: memref<1x1x8x8xbf16, #tpu.memory_space<vmem>>, %arg8: memref<8x1xf32, #tpu.memory_space<vmem>>, %arg9: memref<8x1xf32, #tpu.memory_space<vmem>>, %arg10: memref<8x8xf32, #tpu.memory_space<vmem>>) attributes {dimension_semantics = [#tpu.dimension_semantics<parallel>, #tpu.dimension_semantics<parallel>, #tpu.dimension_semantics<parallel>, #tpu.dimension_semantics<arbitrary>], iteration_bounds = array<i64: 2, 4, 1, 1>, scalar_prefetch = 0 : i64, scratch_operands = 3 : i64, tpu.core_type = #tpu.core_type<tc>, window_params = [{transform_indices = @transform_0, window_bounds = array<i64: 1, 1, 8, 8>}, {transform_indices = @transform_1, window_bounds = array<i64: 1, 1, 8, 8>}, {transform_indices = @transform_2, window_bounds = array<i64: 1, 1, 8, 8>}, {transform_indices = @transform_3, window_bounds = array<i64: 1, 1, 8, 8>}]} {
    %c0_i32 = arith.constant 0 : i32
    %0 = arith.cmpi eq, %arg3, %c0_i32 : i32
    %1 = arith.extui %0 : i1 to i32
    %c0_i32_0 = arith.constant 0 : i32
    %2 = arith.cmpi ne, %1, %c0_i32_0 : i32
    scf.if %2 {
      %cst_29 = arith.constant 0xFF800000 : f32
      %36 = vector.broadcast %cst_29 : f32 to vector<8x1xf32>
      %c0_30 = arith.constant 0 : index
      %c0_31 = arith.constant 0 : index
      %37 = vector.load %arg8[%c0_30, %c0_31] : memref<8x1xf32, #tpu.memory_space<vmem>>, vector<8x1xf32>
      tpu.vector_store %arg8[%c0_30, %c0_31], %36 {strides = array<i32>} : memref<8x1xf32, #tpu.memory_space<vmem>>, vector<8x1xf32>,
      %cst_32 = arith.constant 0.000000e+00 : f32
      %38 = vector.broadcast %cst_32 : f32 to vector<8x1xf32>
      %c0_33 = arith.constant 0 : index
      %c0_34 = arith.constant 0 : index
      %39 = vector.load %arg9[%c0_33, %c0_34] : memref<8x1xf32, #tpu.memory_space<vmem>>, vector<8x1xf32>
      tpu.vector_store %arg9[%c0_33, %c0_34], %38 {strides = array<i32>} : memref<8x1xf32, #tpu.memory_space<vmem>>, vector<8x1xf32>,
      %cst_35 = arith.constant 0.000000e+00 : f32
      %40 = vector.broadcast %cst_35 : f32 to vector<8x8xf32>
      %c0_36 = arith.constant 0 : index
      %c0_37 = arith.constant 0 : index
      %41 = vector.load %arg10[%c0_36, %c0_37] : memref<8x8xf32, #tpu.memory_space<vmem>>, vector<8x8xf32>
      tpu.vector_store %arg10[%c0_36, %c0_37], %40 {strides = array<i32>} : memref<8x8xf32, #tpu.memory_space<vmem>>, vector<8x8xf32>,
    } else {
    }
    %c0 = arith.constant 0 : index
    %c0_1 = arith.constant 0 : index
    %c0_2 = arith.constant 0 : index
    %c0_3 = arith.constant 0 : index
    %3 = vector.load %arg4[%c0, %c0_1, %c0_2, %c0_3] : memref<1x1x8x8xbf16, #tpu.memory_space<vmem>>, vector<1x1x8x8xbf16>
    %4 = vector.shape_cast %3 : vector<1x1x8x8xbf16> to vector<8x8xbf16>
    %c0_4 = arith.constant 0 : index
    %c0_5 = arith.constant 0 : index
    %c0_6 = arith.constant 0 : index
    %c0_7 = arith.constant 0 : index
    %5 = vector.load %arg5[%c0_4, %c0_5, %c0_6, %c0_7] : memref<1x1x8x8xbf16, #tpu.memory_space<vmem>>, vector<1x1x8x8xbf16>
    %6 = vector.shape_cast %5 : vector<1x1x8x8xbf16> to vector<8x8xbf16>
    %c0_8 = arith.constant 0 : index
    %c0_9 = arith.constant 0 : index
    %c0_10 = arith.constant 0 : index
    %c0_11 = arith.constant 0 : index
    %7 = vector.load %arg6[%c0_8, %c0_9, %c0_10, %c0_11] : memref<1x1x8x8xbf16, #tpu.memory_space<vmem>>, vector<1x1x8x8xbf16>
    %8 = vector.shape_cast %7 : vector<1x1x8x8xbf16> to vector<8x8xbf16>
    %cst = arith.constant dense<0.000000e+00> : vector<8x8xf32>
    %9 = tpu.matmul %4, %6, %cst {dimension_numbers = #tpu.dot_dimension_numbers<[1], [1], [0], [0], [0, 0, 1, 0], [], []>} : vector<8x8xbf16>, vector<8x8xbf16>, vector<8x8xf32> -> vector<8x8xf32>
    %c0_12 = arith.constant 0 : index
    %c0_13 = arith.constant 0 : index
    %10 = vector.load %arg8[%c0_12, %c0_13] : memref<8x1xf32, #tpu.memory_space<vmem>>, vector<8x1xf32>
    %cst_14 = arith.constant dense<0xFF800000> : vector<8xf32>
    %11 = vector.multi_reduction <maximumf>, %9, %cst_14 [1] : vector<8x8xf32> to vector<8xf32>
    %12 = vector.shape_cast %11 : vector<8xf32> to vector<8x1xf32>
    %13 = arith.maximumf %10, %12 : vector<8x1xf32>
    %14 = arith.subf %10, %13 : vector<8x1xf32>
    %15 = math.exp %14 : vector<8x1xf32>
    %16 = vector.broadcast %13 : vector<8x1xf32> to vector<8x8xf32>
    %17 = arith.subf %9, %16 : vector<8x8xf32>
    %18 = math.exp %17 : vector<8x8xf32>
    %c0_15 = arith.constant 0 : index
    %c0_16 = arith.constant 0 : index
    %19 = vector.load %arg9[%c0_15, %c0_16] : memref<8x1xf32, #tpu.memory_space<vmem>>, vector<8x1xf32>
    %20 = arith.mulf %15, %19 : vector<8x1xf32>
    %cst_17 = arith.constant dense<0.000000e+00> : vector<8xf32>
    %21 = vector.multi_reduction <add>, %18, %cst_17 [1] : vector<8x8xf32> to vector<8xf32>
    %22 = vector.shape_cast %21 : vector<8xf32> to vector<8x1xf32>
    %23 = arith.addf %20, %22 : vector<8x1xf32>
    %c0_18 = arith.constant 0 : index
    %c0_19 = arith.constant 0 : index
    %24 = vector.load %arg9[%c0_18, %c0_19] : memref<8x1xf32, #tpu.memory_space<vmem>>, vector<8x1xf32>
    tpu.vector_store %arg9[%c0_18, %c0_19], %23 {strides = array<i32>} : memref<8x1xf32, #tpu.memory_space<vmem>>, vector<8x1xf32>,
    %c0_20 = arith.constant 0 : index
    %c0_21 = arith.constant 0 : index
    %25 = vector.load %arg10[%c0_20, %c0_21] : memref<8x8xf32, #tpu.memory_space<vmem>>, vector<8x8xf32>
    %26 = vector.broadcast %15 : vector<8x1xf32> to vector<8x8xf32>
    %27 = arith.mulf %26, %25 : vector<8x8xf32>
    %28 = arith.truncf %18 : vector<8x8xf32> to vector<8x8xbf16>
    %cst_22 = arith.constant dense<0.000000e+00> : vector<8x8xf32>
    %29 = tpu.matmul %28, %8, %cst_22 {dimension_numbers = #tpu.dot_dimension_numbers<[1], [0], [0], [1], [0, 0, 1, 1], [], []>} : vector<8x8xbf16>, vector<8x8xbf16>, vector<8x8xf32> -> vector<8x8xf32>
    %30 = arith.addf %27, %29 : vector<8x8xf32>
    %c0_23 = arith.constant 0 : index
    %c0_24 = arith.constant 0 : index
    %31 = vector.load %arg10[%c0_23, %c0_24] : memref<8x8xf32, #tpu.memory_space<vmem>>, vector<8x8xf32>
    tpu.vector_store %arg10[%c0_23, %c0_24], %30 {strides = array<i32>} : memref<8x8xf32, #tpu.memory_space<vmem>>, vector<8x8xf32>,
    %c0_25 = arith.constant 0 : index
    %c0_26 = arith.constant 0 : index
    %32 = vector.load %arg8[%c0_25, %c0_26] : memref<8x1xf32, #tpu.memory_space<vmem>>, vector<8x1xf32>
    tpu.vector_store %arg8[%c0_25, %c0_26], %13 {strides = array<i32>} : memref<8x1xf32, #tpu.memory_space<vmem>>, vector<8x1xf32>,
    %c0_i32_27 = arith.constant 0 : i32
    %33 = arith.cmpi eq, %arg3, %c0_i32_27 : i32
    %34 = arith.extui %33 : i1 to i32
    %c0_i32_28 = arith.constant 0 : i32
    %35 = arith.cmpi ne, %34, %c0_i32_28 : i32
    scf.if %35 {
      %c0_29 = arith.constant 0 : index
      %c0_30 = arith.constant 0 : index
      %36 = vector.load %arg10[%c0_29, %c0_30] : memref<8x8xf32, #tpu.memory_space<vmem>>, vector<8x8xf32>
      %c0_31 = arith.constant 0 : index
      %c0_32 = arith.constant 0 : index
      %37 = vector.load %arg9[%c0_31, %c0_32] : memref<8x1xf32, #tpu.memory_space<vmem>>, vector<8x1xf32>
      %38 = vector.broadcast %37 : vector<8x1xf32> to vector<8x8xf32>
      %39 = arith.divf %36, %38 : vector<8x8xf32>
      %40 = arith.truncf %39 : vector<8x8xf32> to vector<8x8xbf16>
      %c0_33 = arith.constant 0 : index
      %c0_34 = arith.constant 0 : index
      %c0_35 = arith.constant 0 : index
      %c0_36 = arith.constant 0 : index
      %41 = vector.load %arg7[%c0_33, %c0_34, %c0_35, %c0_36] : memref<1x1x8x8xbf16, #tpu.memory_space<vmem>>, vector<1x1x8x8xbf16>
      %42 = vector.shape_cast %41 : vector<1x1x8x8xbf16> to vector<8x8xbf16>
      %43 = vector.shape_cast %40 : vector<8x8xbf16> to vector<1x1x8x8xbf16>
      tpu.vector_store %arg7[%c0_33, %c0_34, %c0_35, %c0_36], %43 {strides = array<i32>} : memref<1x1x8x8xbf16, #tpu.memory_space<vmem>>, vector<1x1x8x8xbf16>,
    } else {
    }
    return
  }
  func.func @transform_0(%arg0: i32, %arg1: i32, %arg2: i32, %arg3: i32) -> (i32, i32, i32, i32) {
    %c0_i32 = arith.constant 0 : i32
    %c0_i32_0 = arith.constant 0 : i32
    return %arg0, %arg1, %arg2, %c0_i32 : i32, i32, i32, i32
  }
  func.func @transform_1(%arg0: i32, %arg1: i32, %arg2: i32, %arg3: i32) -> (i32, i32, i32, i32) {
    %c0_i32 = arith.constant 0 : i32
    %c0_i32_0 = arith.constant 0 : i32
    return %arg0, %arg1, %arg3, %c0_i32 : i32, i32, i32, i32
  }
  func.func @transform_2(%arg0: i32, %arg1: i32, %arg2: i32, %arg3: i32) -> (i32, i32, i32, i32) {
    %c0_i32 = arith.constant 0 : i32
    %c0_i32_0 = arith.constant 0 : i32
    return %arg0, %arg1, %arg3, %c0_i32 : i32, i32, i32, i32
  }
  func.func @transform_3(%arg0: i32, %arg1: i32, %arg2: i32, %arg3: i32) -> (i32, i32, i32, i32) {
    %c0_i32 = arith.constant 0 : i32
    %c0_i32_0 = arith.constant 0 : i32
    return %arg0, %arg1, %arg2, %c0_i32 : i32, i32, i32, i32
  }
}

module attributes {stable_mosaic.version = 11 : i64} {
  func.func @_qkv_proj_kernel(%arg0: i32, %arg1: i32, %arg2: i32, %arg3: memref<16x32xf32, #tpu.memory_space<vmem>>, %arg4: memref<16x32xf32, #tpu.memory_space<vmem>>, %arg5: memref<16x32xf32, #tpu.memory_space<vmem>>, %arg6: memref<32x32xbf16, #tpu.memory_space<vmem>>, %arg7: memref<32x32xbf16, #tpu.memory_space<vmem>>, %arg8: memref<32x32xbf16, #tpu.memory_space<vmem>>, %arg9: memref<1x32xf32, #tpu.memory_space<vmem>>, %arg10: memref<1x32xf32, #tpu.memory_space<vmem>>, %arg11: memref<1x32xf32, #tpu.memory_space<vmem>>, %arg12: memref<16x32xbf16, #tpu.memory_space<vmem>>, %arg13: memref<16x32xbf16, #tpu.memory_space<vmem>>, %arg14: memref<16x32xbf16, #tpu.memory_space<vmem>>, %arg15: memref<16x32xf32, #tpu.memory_space<vmem>>, %arg16: memref<16x32xf32, #tpu.memory_space<vmem>>, %arg17: memref<16x32xf32, #tpu.memory_space<vmem>>) attributes {dimension_semantics = [#tpu.dimension_semantics<parallel>, #tpu.dimension_semantics<parallel>, #tpu.dimension_semantics<arbitrary>], iteration_bounds = array<i64: 1, 1, 1>, scalar_prefetch = 0 : i64, scratch_operands = 3 : i64, tpu.core_type = #tpu.core_type<tc>, window_params = [{transform_indices = @transform_0, window_bounds = array<i64: 16, 32>}, {transform_indices = @transform_1, window_bounds = array<i64: 16, 32>}, {transform_indices = @transform_2, window_bounds = array<i64: 16, 32>}, {transform_indices = @transform_3, window_bounds = array<i64: 32, 32>}, {transform_indices = @transform_4, window_bounds = array<i64: 32, 32>}, {transform_indices = @transform_5, window_bounds = array<i64: 32, 32>}, {transform_indices = @transform_6, window_bounds = array<i64: 1, 32>}, {transform_indices = @transform_7, window_bounds = array<i64: 1, 32>}, {transform_indices = @transform_8, window_bounds = array<i64: 1, 32>}, {transform_indices = @transform_9, window_bounds = array<i64: 16, 32>}, {transform_indices = @transform_10, window_bounds = array<i64: 16, 32>}, {transform_indices = @transform_11, window_bounds = array<i64: 16, 32>}]} {
    %c0_i32 = arith.constant 0 : i32
    %0 = arith.cmpi eq, %arg2, %c0_i32 : i32
    %1 = arith.extui %0 : i1 to i32
    %c0_i32_0 = arith.constant 0 : i32
    %2 = arith.cmpi ne, %1, %c0_i32_0 : i32
    scf.if %2 {
      %cst_28 = arith.constant 0.000000e+00 : f32
      %27 = vector.broadcast %cst_28 : f32 to vector<16x32xf32>
      %c0_29 = arith.constant 0 : index
      %c0_30 = arith.constant 0 : index
      %28 = vector.load %arg15[%c0_29, %c0_30] : memref<16x32xf32, #tpu.memory_space<vmem>>, vector<16x32xf32>
      tpu.vector_store %arg15[%c0_29, %c0_30], %27 {strides = array<i32>} : memref<16x32xf32, #tpu.memory_space<vmem>>, vector<16x32xf32>,
      %cst_31 = arith.constant 0.000000e+00 : f32
      %29 = vector.broadcast %cst_31 : f32 to vector<16x32xf32>
      %c0_32 = arith.constant 0 : index
      %c0_33 = arith.constant 0 : index
      %30 = vector.load %arg16[%c0_32, %c0_33] : memref<16x32xf32, #tpu.memory_space<vmem>>, vector<16x32xf32>
      tpu.vector_store %arg16[%c0_32, %c0_33], %29 {strides = array<i32>} : memref<16x32xf32, #tpu.memory_space<vmem>>, vector<16x32xf32>,
      %cst_34 = arith.constant 0.000000e+00 : f32
      %31 = vector.broadcast %cst_34 : f32 to vector<16x32xf32>
      %c0_35 = arith.constant 0 : index
      %c0_36 = arith.constant 0 : index
      %32 = vector.load %arg17[%c0_35, %c0_36] : memref<16x32xf32, #tpu.memory_space<vmem>>, vector<16x32xf32>
      tpu.vector_store %arg17[%c0_35, %c0_36], %31 {strides = array<i32>} : memref<16x32xf32, #tpu.memory_space<vmem>>, vector<16x32xf32>,
    } else {
    }
    %c0 = arith.constant 0 : index
    %c0_1 = arith.constant 0 : index
    %3 = vector.load %arg15[%c0, %c0_1] : memref<16x32xf32, #tpu.memory_space<vmem>>, vector<16x32xf32>
    %c0_2 = arith.constant 0 : index
    %c0_3 = arith.constant 0 : index
    %4 = vector.load %arg3[%c0_2, %c0_3] : memref<16x32xf32, #tpu.memory_space<vmem>>, vector<16x32xf32>
    %5 = arith.truncf %4 : vector<16x32xf32> to vector<16x32xbf16>
    %c0_4 = arith.constant 0 : index
    %c0_5 = arith.constant 0 : index
    %6 = vector.load %arg6[%c0_4, %c0_5] : memref<32x32xbf16, #tpu.memory_space<vmem>>, vector<32x32xbf16>
    %cst = arith.constant dense<0.000000e+00> : vector<16x32xf32>
    %7 = tpu.matmul %5, %6, %cst {dimension_numbers = #tpu.dot_dimension_numbers<[1], [1], [0], [0], [0, 0, 1, 0], [], []>} : vector<16x32xbf16>, vector<32x32xbf16>, vector<16x32xf32> -> vector<16x32xf32>
    %8 = arith.addf %3, %7 : vector<16x32xf32>
    %c0_6 = arith.constant 0 : index
    %c0_7 = arith.constant 0 : index
    %9 = vector.load %arg15[%c0_6, %c0_7] : memref<16x32xf32, #tpu.memory_space<vmem>>, vector<16x32xf32>
    tpu.vector_store %arg15[%c0_6, %c0_7], %8 {strides = array<i32>} : memref<16x32xf32, #tpu.memory_space<vmem>>, vector<16x32xf32>,
    %c0_8 = arith.constant 0 : index
    %c0_9 = arith.constant 0 : index
    %10 = vector.load %arg16[%c0_8, %c0_9] : memref<16x32xf32, #tpu.memory_space<vmem>>, vector<16x32xf32>
    %c0_10 = arith.constant 0 : index
    %c0_11 = arith.constant 0 : index
    %11 = vector.load %arg4[%c0_10, %c0_11] : memref<16x32xf32, #tpu.memory_space<vmem>>, vector<16x32xf32>
    %12 = arith.truncf %11 : vector<16x32xf32> to vector<16x32xbf16>
    %c0_12 = arith.constant 0 : index
    %c0_13 = arith.constant 0 : index
    %13 = vector.load %arg7[%c0_12, %c0_13] : memref<32x32xbf16, #tpu.memory_space<vmem>>, vector<32x32xbf16>
    %cst_14 = arith.constant dense<0.000000e+00> : vector<16x32xf32>
    %14 = tpu.matmul %12, %13, %cst_14 {dimension_numbers = #tpu.dot_dimension_numbers<[1], [1], [0], [0], [0, 0, 1, 0], [], []>} : vector<16x32xbf16>, vector<32x32xbf16>, vector<16x32xf32> -> vector<16x32xf32>
    %15 = arith.addf %10, %14 : vector<16x32xf32>
    %c0_15 = arith.constant 0 : index
    %c0_16 = arith.constant 0 : index
    %16 = vector.load %arg16[%c0_15, %c0_16] : memref<16x32xf32, #tpu.memory_space<vmem>>, vector<16x32xf32>
    tpu.vector_store %arg16[%c0_15, %c0_16], %15 {strides = array<i32>} : memref<16x32xf32, #tpu.memory_space<vmem>>, vector<16x32xf32>,
    %c0_17 = arith.constant 0 : index
    %c0_18 = arith.constant 0 : index
    %17 = vector.load %arg17[%c0_17, %c0_18] : memref<16x32xf32, #tpu.memory_space<vmem>>, vector<16x32xf32>
    %c0_19 = arith.constant 0 : index
    %c0_20 = arith.constant 0 : index
    %18 = vector.load %arg5[%c0_19, %c0_20] : memref<16x32xf32, #tpu.memory_space<vmem>>, vector<16x32xf32>
    %19 = arith.truncf %18 : vector<16x32xf32> to vector<16x32xbf16>
    %c0_21 = arith.constant 0 : index
    %c0_22 = arith.constant 0 : index
    %20 = vector.load %arg8[%c0_21, %c0_22] : memref<32x32xbf16, #tpu.memory_space<vmem>>, vector<32x32xbf16>
    %cst_23 = arith.constant dense<0.000000e+00> : vector<16x32xf32>
    %21 = tpu.matmul %19, %20, %cst_23 {dimension_numbers = #tpu.dot_dimension_numbers<[1], [1], [0], [0], [0, 0, 1, 0], [], []>} : vector<16x32xbf16>, vector<32x32xbf16>, vector<16x32xf32> -> vector<16x32xf32>
    %22 = arith.addf %17, %21 : vector<16x32xf32>
    %c0_24 = arith.constant 0 : index
    %c0_25 = arith.constant 0 : index
    %23 = vector.load %arg17[%c0_24, %c0_25] : memref<16x32xf32, #tpu.memory_space<vmem>>, vector<16x32xf32>
    tpu.vector_store %arg17[%c0_24, %c0_25], %22 {strides = array<i32>} : memref<16x32xf32, #tpu.memory_space<vmem>>, vector<16x32xf32>,
    %c0_i32_26 = arith.constant 0 : i32
    %24 = arith.cmpi eq, %arg2, %c0_i32_26 : i32
    %25 = arith.extui %24 : i1 to i32
    %c0_i32_27 = arith.constant 0 : i32
    %26 = arith.cmpi ne, %25, %c0_i32_27 : i32
    scf.if %26 {
      %c0_28 = arith.constant 0 : index
      %c0_29 = arith.constant 0 : index
      %27 = vector.load %arg15[%c0_28, %c0_29] : memref<16x32xf32, #tpu.memory_space<vmem>>, vector<16x32xf32>
      %c0_30 = arith.constant 0 : index
      %c0_31 = arith.constant 0 : index
      %28 = vector.load %arg9[%c0_30, %c0_31] : memref<1x32xf32, #tpu.memory_space<vmem>>, vector<1x32xf32>
      %29 = vector.broadcast %28 : vector<1x32xf32> to vector<16x32xf32>
      %30 = arith.addf %27, %29 : vector<16x32xf32>
      %cst_32 = arith.constant 0.353553385 : f32
      %31 = vector.broadcast %cst_32 : f32 to vector<16x32xf32>
      %32 = arith.mulf %30, %31 : vector<16x32xf32>
      %33 = arith.truncf %32 : vector<16x32xf32> to vector<16x32xbf16>
      %c0_33 = arith.constant 0 : index
      %c0_34 = arith.constant 0 : index
      %34 = vector.load %arg12[%c0_33, %c0_34] : memref<16x32xbf16, #tpu.memory_space<vmem>>, vector<16x32xbf16>
      tpu.vector_store %arg12[%c0_33, %c0_34], %33 {strides = array<i32>} : memref<16x32xbf16, #tpu.memory_space<vmem>>, vector<16x32xbf16>,
      %c0_35 = arith.constant 0 : index
      %c0_36 = arith.constant 0 : index
      %35 = vector.load %arg16[%c0_35, %c0_36] : memref<16x32xf32, #tpu.memory_space<vmem>>, vector<16x32xf32>
      %c0_37 = arith.constant 0 : index
      %c0_38 = arith.constant 0 : index
      %36 = vector.load %arg10[%c0_37, %c0_38] : memref<1x32xf32, #tpu.memory_space<vmem>>, vector<1x32xf32>
      %37 = vector.broadcast %36 : vector<1x32xf32> to vector<16x32xf32>
      %38 = arith.addf %35, %37 : vector<16x32xf32>
      %39 = arith.truncf %38 : vector<16x32xf32> to vector<16x32xbf16>
      %c0_39 = arith.constant 0 : index
      %c0_40 = arith.constant 0 : index
      %40 = vector.load %arg13[%c0_39, %c0_40] : memref<16x32xbf16, #tpu.memory_space<vmem>>, vector<16x32xbf16>
      tpu.vector_store %arg13[%c0_39, %c0_40], %39 {strides = array<i32>} : memref<16x32xbf16, #tpu.memory_space<vmem>>, vector<16x32xbf16>,
      %c0_41 = arith.constant 0 : index
      %c0_42 = arith.constant 0 : index
      %41 = vector.load %arg17[%c0_41, %c0_42] : memref<16x32xf32, #tpu.memory_space<vmem>>, vector<16x32xf32>
      %c0_43 = arith.constant 0 : index
      %c0_44 = arith.constant 0 : index
      %42 = vector.load %arg11[%c0_43, %c0_44] : memref<1x32xf32, #tpu.memory_space<vmem>>, vector<1x32xf32>
      %43 = vector.broadcast %42 : vector<1x32xf32> to vector<16x32xf32>
      %44 = arith.addf %41, %43 : vector<16x32xf32>
      %45 = arith.truncf %44 : vector<16x32xf32> to vector<16x32xbf16>
      %c0_45 = arith.constant 0 : index
      %c0_46 = arith.constant 0 : index
      %46 = vector.load %arg14[%c0_45, %c0_46] : memref<16x32xbf16, #tpu.memory_space<vmem>>, vector<16x32xbf16>
      tpu.vector_store %arg14[%c0_45, %c0_46], %45 {strides = array<i32>} : memref<16x32xbf16, #tpu.memory_space<vmem>>, vector<16x32xbf16>,
    } else {
    }
    return
  }
  func.func @transform_0(%arg0: i32, %arg1: i32, %arg2: i32) -> (i32, i32) {
    %c0_i32 = arith.constant 0 : i32
    return %arg0, %arg2 : i32, i32
  }
  func.func @transform_1(%arg0: i32, %arg1: i32, %arg2: i32) -> (i32, i32) {
    %c0_i32 = arith.constant 0 : i32
    return %arg0, %arg2 : i32, i32
  }
  func.func @transform_2(%arg0: i32, %arg1: i32, %arg2: i32) -> (i32, i32) {
    %c0_i32 = arith.constant 0 : i32
    return %arg0, %arg2 : i32, i32
  }
  func.func @transform_3(%arg0: i32, %arg1: i32, %arg2: i32) -> (i32, i32) {
    %c0_i32 = arith.constant 0 : i32
    return %arg1, %arg2 : i32, i32
  }
  func.func @transform_4(%arg0: i32, %arg1: i32, %arg2: i32) -> (i32, i32) {
    %c0_i32 = arith.constant 0 : i32
    return %arg1, %arg2 : i32, i32
  }
  func.func @transform_5(%arg0: i32, %arg1: i32, %arg2: i32) -> (i32, i32) {
    %c0_i32 = arith.constant 0 : i32
    return %arg1, %arg2 : i32, i32
  }
  func.func @transform_6(%arg0: i32, %arg1: i32, %arg2: i32) -> (i32, i32) {
    %c0_i32 = arith.constant 0 : i32
    %c0_i32_0 = arith.constant 0 : i32
    return %c0_i32, %arg1 : i32, i32
  }
  func.func @transform_7(%arg0: i32, %arg1: i32, %arg2: i32) -> (i32, i32) {
    %c0_i32 = arith.constant 0 : i32
    %c0_i32_0 = arith.constant 0 : i32
    return %c0_i32, %arg1 : i32, i32
  }
  func.func @transform_8(%arg0: i32, %arg1: i32, %arg2: i32) -> (i32, i32) {
    %c0_i32 = arith.constant 0 : i32
    %c0_i32_0 = arith.constant 0 : i32
    return %c0_i32, %arg1 : i32, i32
  }
  func.func @transform_9(%arg0: i32, %arg1: i32, %arg2: i32) -> (i32, i32) {
    %c0_i32 = arith.constant 0 : i32
    return %arg0, %arg1 : i32, i32
  }
  func.func @transform_10(%arg0: i32, %arg1: i32, %arg2: i32) -> (i32, i32) {
    %c0_i32 = arith.constant 0 : i32
    return %arg0, %arg1 : i32, i32
  }
  func.func @transform_11(%arg0: i32, %arg1: i32, %arg2: i32) -> (i32, i32) {
    %c0_i32 = arith.constant 0 : i32
    return %arg0, %arg1 : i32, i32
  }
}

</mosaic_0001>

<bundles_post_ra>
// kernel: multi_head_attention.4
= control target key start
LH: loop header
LB: loop body
LE: loop exit
PB: predicated region body
PF: predicated region fallthrough
CT: control target
= control target key end

     0   :  { %s714_s12 = smov 0   ;;  %s716_s13 = smov 0   ;;  %s788_s0 = inlined_call_operand.vmem [shape: bf16[2,4,8,8], index: 0, kind: input, shape index: {}]   ;;  %s789_s1 = inlined_call_operand.vmem [shape: bf16[2,4,8,8], index: 1, kind: input, shape index: {}]   ;;  %s790_s2 = inlined_call_operand.vmem [shape: bf16[2,4,8,8], index: 2, kind: input, shape index: {}]   ;;  %s791_s3 = inlined_call_operand.vmem [shape: bf16[2,4,8,8], index: 3, kind: output, shape index: {}]  }
   0x1   :  { %s718_s14 = smov 0   ;;  %s720_s15 = smov 0  }
   0x2   :  { %s722_s16 = smov 0  }
   0x3 LB: > { %s35_s17 = sadd.s32 1, %s681_s14  ;;  %s39_s18 = sadd.s32 1, %s685_s15  ;;  %s689_s16 = sphi %s722_s16, %s13_s16   ;;  %s685_s15 = sphi %s720_s15, %s795_s15   ;;  %s681_s14 = sphi %s718_s14, %s794_s14   ;;  %s677_s13 = sphi %s716_s13, %s793_s13   ;;  %s673_s12 = sphi %s714_s12, %s792_s12  }
   0x4   : > { %p37_p0 = scmp.ge.s32.totalorder %s35_s17, 4  ;;  %p586_p1 = scmp.ge.s32.totalorder %s689_s16, 1 }
   0x5   : > { %p217_p2 = scmp.lt.s32.totalorder %s689_s16, 9 }
   0x6   : > { %s797_s17 = smov (%p37_p0, %s35_s17), 0  ;;  %s799_s18 = smov (!%p37_p0, %s39_s18), %s685_s15 }
   0x7   : > { %p218_p3 = pnand %p586_p1, %p217_p2  ;;  %p41_p4 = scmp.ge.s32.totalorder %s799_s18, 2 }
   0x8   : > { %p275_p5 = scmp.lt.s32.totalorder (!%p218_p3), %s677_s13, 1  ;;  %p277_p6 = scmp.lt.s32.totalorder (!%p218_p3), %s673_s12, 3 }
   0x9   : > { %s801_s18 = smov (%p41_p4, %s799_s18), 0  ;;  %221 = sbr.rel (%p218_p3) target bundleno = 663 (0x297), region = 32 }
   0xe   : > { %vm327_vm0 = vcmask 64512   ;;  %v691_v0 = vmov 0.0   ;;  %s803_s13 = smov (!%p275_p5, %s677_s13), 1  ;;  %s805_s12 = smov (!%p277_p6, %s673_s12), 3  ;;  %vm324_vm1 = vcmask 7168   ;;  %v692_v4 = vmov -inf  }
   0xf   : > { %328 = vst.msk [vmem:[#allocation4] sm:$0xff] %vm327_vm0, %v691_v0  ;;  %s587_s19 = sshll.u32 %s803_s13, 2  ;;  %v693_v8 = vmov 0   ;;  %vm387_vm2 = vcmask 1043456   ;;  %vm433_vm7 = vcmask 60416  }
  0x10   : > { %s283_s20 = sadd.s32 %s587_s19, %s805_s12  ;;  %325 = vst.msk [vmem:[#allocation2] sm:$0xff] %vm324_vm1, %v692_v4  ;;  %642 = vset.pattern.permute.xlu0 %v693_v8  ;;  %644 = vset.pattern.permute.xlu2 %v693_v8 }
  0x11   : > { %s745_s21 = sshll.u32 %s283_s20, 2  ;;  %326 = vst.msk [vmem:[#allocation3] sm:$0xff] %vm324_vm1, %v691_v0  ;;  %643 = vset.pattern.permute.xlu1 %v693_v8 }
  0x12   : > { %s296_s24 = scalar_lea.vmem %s789_s1, %s745_s21  ;;  %s285_s27 = scalar_lea.vmem %s788_s0, %s745_s21 }
  0x13   : > { %v330_v1 = vld [vmem:[%s296_s24] sm:$0xf]  ;;  %s307_s30 = scalar_lea.vmem %s790_s2, %s745_s21  ;;  %s318_s6 = scalar_lea.vmem %s791_s3, %s745_s21 }
  0x14   : > { %v337_v2 = vsel %vm327_vm0, %v330_v1, 0  ;;  %v329_v3 = vld [vmem:[%s285_s27] sm:$0xf] }
  0x15   : > { %346 = vmatpush.bf16.xpose.msra.mxu0 %v337_v2  ;;  %v331_v15 = vld [vmem:[%s307_s30] sm:$0xf] }
  0x16   : > { %v389_v16 = vsel %vm387_vm2, %v331_v15, 0  ;;  %v376_v27 = vld [vmem:[#allocation4] sm:$0xff] }
  0x17   : > { %v352_v9 = vld [vmem:[#allocation2] sm:$0xff]  ;;  %398 = vmatpush.bf16.msra.mxu1 %v389_v16 }
  0x18   : > { %v368_v23 = vld [vmem:[#allocation3] sm:$0xff] }
  0x1c   : > { %595 = vmatmul.msk.bf16.vlgmr.msra.gmra.mxu0 %vm327_vm0, %v329_v3 }
  0x99   : > { %v348_v5 = vpop.f32.mrf.mxu0 }
  0x9a   : > { %v353_v6 = vsel %vm327_vm0, %v348_v5, -inf }
  0x9b   : > { %354 = vmax.xlane.f32.xlu0 %v353_v6 }
  0xa1   : > { %v350_v7 = vpop.f32.mrf.mxu0 }
 0x10e   : > { %v355_v10 = vpop.xlane.xlu0 %354 }
 0x10f   : > { %v356_v11 = vmax.f32 %v352_v9, %v355_v10 }
 0x111   : > { %v357_v12 = vsub.f32 %v352_v9, %v356_v11  ;;  %406 = vst.msk [vmem:[#allocation2] sm:$0xff] %vm324_vm1, %v356_v11  ;;  %362 = vperm.xlu0 %642, %v356_v11  }
 0x113   : > { %v358_v13 = vmul.f32 1.442695, %v357_v12 }
 0x115   : > { %645 = vpow2.f32 %v358_v13 }
 0x11b   : > { %v646_v14 = vpop.eup %645 }
 0x11c   : > { %379 = vperm.xlu2 %644, %v646_v14   ;;  %v369_v24 = vmul.f32 %v646_v14, %v368_v23 }
 0x176   : > { %v380_v28 = vpop.permute.xlu2 %379 }
 0x177   : > { %v382_v29 = vmul.f32 %v380_v28, %v376_v27 }
 0x183   : > { %v363_v17 = vpop.permute.xlu0 %362 }
 0x184   : > { %v365_v18 = vsub.f32 %v348_v5, %v363_v17 }
 0x186   : > { %v366_v19 = vmul.f32 1.442695, %v365_v18 }
 0x188   : > { %647 = vpow2.f32 %v366_v19 }
 0x18e   : > { %v648_v20 = vpop.eup %647 }
 0x18f   : > { %v370_v21 = vsel %vm327_vm0, %v648_v20, 0.0  ;;  %v383_v22 = vpack.c.bf16 %v648_v20, %v648_v20 }
 0x190   : > { %371 = vadd.xlane.f32.xlu1 %v370_v21 }
 0x191   : > { %596 = vmatmul.msk.bf16.vlgmr.msra.gmra.mxu1 %vm327_vm0, %v383_v22 }
 0x203   : > { %v372_v25 = vpop.xlane.xlu1 %371 }
 0x204   : > { %v373_v26 = vadd.f32 %v372_v25, %v369_v24 }
 0x206   : > { %375 = vst.msk [vmem:[#allocation3] sm:$0xff] %vm324_vm1, %v373_v26 }
 0x20d   : > { %v411_v30 = vld [vmem:[#allocation3] sm:$0xff] }
 0x20e   : > { %v400_v31 = vpop.f32.mrf.mxu1  ;;  %414 = vperm.xlu1 %643, %v411_v30  }
 0x20f   : > { %v404_v32 = vadd.f32 %v400_v31, %v382_v29 }
 0x211   : > { %405 = vst.msk [vmem:[#allocation4] sm:$0xff] %vm327_vm0, %v404_v32 }
 0x216   : > { %v402_v33 = vpop.f32.mrf.mxu1 }
 0x218   : > { %v410_v44 = vld [vmem:[#allocation4] sm:$0xff] }
 0x280   : > { %v415_v34 = vpop.permute.xlu1 %414 }
 0x281   : > { %649 = vrcp.f32 %v415_v34  ;;  %v428_v38 = vand.u32 2147483648, %v415_v34  ;;  %v426_v40 = vand.u32 2147483647, %v415_v34  ;;  %vm422_vm4 = vweird.f32 %v415_v34 }
 0x283   : > { %v429_v42 = vor.u32 1.1754944e-38, %v428_v38  ;;  %vm427_vm6 = vcmp.eq.f32.partialorder %v426_v40, 8.507059e+37 }
 0x287   : > { %v650_v35 = vpop.eup %649 }
 0x288   : > { %v418_v36 = vmul.f32 %v650_v35, %v415_v34  ;;  %vm423_vm3 = vweird.f32 %v650_v35 }
 0x289   : > { %vm424_vm5 = vmor %vm422_vm4, %vm423_vm3 }
 0x28a   : > { %v419_v37 = vsub.f32 1.0, %v418_v36 }
 0x28c   : > { %v420_v39 = vmul.f32 %v650_v35, %v419_v37 }
 0x28e   : > { %v421_v41 = vadd.f32 %v650_v35, %v420_v39 }
 0x290   : > { %v425_v43 = vsel %vm424_vm5, %v650_v35, %v421_v41 }
 0x291   : > { %v430_v45 = vsel %vm427_vm6, %v429_v42, %v425_v43 }
 0x292   : > { %v431_v46 = vmul.f32 %v430_v45, %v410_v44 }
 0x294   : > { %v432_v47 = vpack.c.bf16 %v431_v46, %v431_v46 }
 0x296   : > { %434 = vst.msk [vmem:[%s318_s6] sm:$0xf] %vm433_vm7, %v432_v47 }
 0x297 PF: > { %s13_s16 = sadd.s32 1, %s689_s16   ;;  %s792_s12 = smov %s681_s14 }
 0x298   : > { %p10_p7 = scmp.ge.s32.totalorder %s13_s16, 10   ;;  %s793_s13 = smov %s685_s15 }
 0x299   : > { %s794_s14 = smov %s797_s17  ;;  %s795_s15 = smov %s801_s18 }
 0x29a   :  { %12 = sbr.rel (!%p10_p7) target bundleno = 3 (0x3), region = 76 }

// kernel: multi_head_attention.5
= control target key start
LH: loop header
LB: loop body
LE: loop exit
PB: predicated region body
PF: predicated region fallthrough
CT: control target
= control target key end

     0   :  { %vm20_vm0 = vcmask 261120   ;;  %v152_v1 = vmov 0.0   ;;  %s200_s0 = inlined_call_operand.vmem [shape: bf16[16,32], index: 0, kind: input, shape index: {}]   ;;  %s201_s1 = inlined_call_operand.vmem [shape: bf16[32,32], index: 1, kind: input, shape index: {}]   ;;  %s202_s2 = inlined_call_operand.vmem [shape: f32[1,32], index: 2, kind: input, shape index: {}]   ;;  %s203_s3 = inlined_call_operand.hbm [shape: f32[16,32], index: 3, kind: output, shape index: {}]  }
   0x1   :  { %v120_v0 = vld [vmem:[%s201_s1 + $0x8] sm:$0xff]  ;;  %21 = vst.msk [vmem:[#allocation2] sm:$0xff] %vm20_vm0, %v152_v1 }
   0x2   :  { %8 = vsyncpa [#allocation4], 0  ;;  %v54_v2 = vsel %vm20_vm0, %v120_v0, 0  ;;  %22 = vst.msk [vmem:[#allocation2 + $0x8] sm:$0xff] %vm20_vm0, %v152_v1  ;;  %v119_v3 = vld [vmem:[%s201_s1] sm:$0xff]  ;;  %s93_s22 = sshll.u32 %s203_s3, 4  ;;  %s94_s22 = int_to_ptr.hbm [resolvable:$true] %s93_s22 }
   0x3   :  { %62 = vmatpush.bf16.xpose.msra.mxu0 %v54_v2  ;;  %v51_v4 = vsel %vm20_vm0, %v119_v3, 0  ;;  %v118_v5 = vld [vmem:[%s200_s0] sm:$0xff]  ;;  %s153_s0 = smov [#allocation3]   ;;  %s155_s23 = smov 8  }
   0x4   :  { %v125_v10 = vld [vmem:[%s202_s2] ss:$0 sm:$0xff]  ;;  %s91_s1 = sshll.u32 %s153_s0, 4  ;;  %s154_s2 = smov 128   ;;  %s92_s1 = int_to_ptr.vmem [resolvable:$true] %s91_s1 }
   0x8   :  { %v23_v6 = vld [vmem:[#allocation2] sm:$0xff] }
   0x9   :  { %v24_v9 = vld [vmem:[#allocation2 + $0x8] sm:$0xff] }
   0xb   :  { %63 = vmatpush.bf16.xpose.msra.mxu0 %v51_v4 }
  0x12   :  { %117 = vmatmul.msk.bf16.vlgmr.msra.gmra.mxu0 %vm20_vm0, %v118_v5 }
  0x8f   :  { %v65_v7 = vpop.f32.mrf.mxu0 }
  0x90   :  { %v70_v8 = vadd.f32 %v65_v7, %v23_v6 }
  0x92   :  { %72 = vst.msk [vmem:[#allocation2] sm:$0xff] %vm20_vm0, %v70_v8 }
  0x97   :  { %v67_v11 = vpop.f32.mrf.mxu0 }
  0x98   :  { %v71_v12 = vadd.f32 %v67_v11, %v24_v9 }
  0x99   :  { %v77_v13 = vld [vmem:[#allocation2] sm:$0xff] }
  0x9a   :  { %73 = vst.msk [vmem:[#allocation2 + $0x8] sm:$0xff] %vm20_vm0, %v71_v12  ;;  %v83_v14 = vadd.f32 %v125_v10, %v77_v13 }
  0x9c   :  { %85 = vst.msk [vmem:[#allocation3] sm:$0xff] %vm20_vm0, %v83_v14 }
  0xa1   :  { %v78_v15 = vld [vmem:[#allocation2 + $0x8] sm:$0xff] }
  0xa2   :  { %v84_v16 = vadd.f32 %v125_v10, %v78_v15 }
  0xa4   :  { %86 = vst.msk [vmem:[#allocation3 + $0x8] sm:$0xff] %vm20_vm0, %v84_v16 }
  0xa5   :  { %99 = dma.vmem_to_hbm [thread:$0]  %s92_s1, 256, %s94_s22, [#allocation4], %s154_s2, %s154_s2, %s155_s23  }
  0xa6   :  { %150 = dma.done.wait [#allocation4], 256  }
  0xa7   :  { %151 = vsyncadd [#allocation4], 4294967040 }
  0xa8   :  { %104 = vsyncpa [#allocation4], 1 }

// kernel: multi_head_attention.3
= control target key start
LH: loop header
LB: loop body
LE: loop exit
PB: predicated region body
PF: predicated region fallthrough
CT: control target
= control target key end

     0   :  { %17 = vsyncpa [#allocation6], 0  ;;  %s680_s0 = inlined_call_operand.hbm [shape: f32[16,32], index: 0, kind: input, shape index: {}]   ;;  %s681_s1 = inlined_call_operand.hbm [shape: f32[16,32], index: 1, kind: input, shape index: {}]   ;;  %s682_s2 = inlined_call_operand.hbm [shape: f32[16,32], index: 2, kind: input, shape index: {}]   ;;  %s683_s3 = inlined_call_operand.hbm [shape: bf16[32,32], index: 3, kind: input, shape index: {}]   ;;  %s684_s4 = inlined_call_operand.hbm [shape: bf16[32,32], index: 4, kind: input, shape index: {}]   ;;  %s685_s5 = inlined_call_operand.hbm [shape: bf16[32,32], index: 5, kind: input, shape index: {}]   ;;  %s686_s6 = inlined_call_operand.vmem [shape: f32[1,32], index: 6, kind: input, shape index: {}]   ;;  %s687_s7 = inlined_call_operand.vmem [shape: f32[1,32], index: 7, kind: input, shape index: {}]   ;;  %s688_s8 = inlined_call_operand.vmem [shape: f32[1,32], index: 8, kind: input, shape index: {}]   ;;  %s689_s9 = inlined_call_operand.vmem [shape: bf16[16,32], index: 9, kind: output, shape index: {0}]   ;;  %s690_s10 = inlined_call_operand.vmem [shape: bf16[16,32], index: 10, kind: output, shape index: {1}]   ;;  %s691_s11 = inlined_call_operand.vmem [shape: bf16[16,32], index: 11, kind: output, shape index: {2}]  }
   0x1   :  { %18 = vsyncpa [#allocation8], 0 }
   0x2   :  { %19 = vsyncpa [#allocation11], 0 }
   0x3   :  { %20 = vsyncpa [#allocation14], 0  ;;  %s38_s19 = sshll.u32 %s681_s1, 4  ;;  %s537_s20 = smov [#allocation7]   ;;  %s39_s19 = int_to_ptr.hbm [resolvable:$true] %s38_s19 }
   0x4   :  { %s40_s21 = sshll.u32 %s537_s20, 4  ;;  %s64_s24 = sshll.u32 %s683_s3, 4  ;;  %s41_s21 = int_to_ptr.vmem [resolvable:$true] %s40_s21  ;;  %s65_s24 = int_to_ptr.hbm [resolvable:$true] %s64_s24 }
   0x5   :  { %s538_s25 = smov 128   ;;  %s539_s26 = smov 8  }
   0x6   :  { %46 = dma.hbm_to_vmem [thread:$0]  %s39_s19, 256, %s41_s21, [#allocation8], %s538_s25, %s538_s25, %s539_s26  }
   0x7   :  { %s540_s27 = smov [#allocation10]   ;;  %s541_s29 = smov 64  }
   0x8   :  { %s66_s28 = sshll.u32 %s540_s27, 4  ;;  %s542_s30 = smov 4   ;;  %s67_s28 = int_to_ptr.vmem [resolvable:$true] %s66_s28 }
   0x9   :  { %72 = dma.hbm_to_vmem [thread:$0]  %s65_s24, 256, %s67_s28, [#allocation11], %s541_s29, %s541_s29, %s542_s30  }
   0xa   :  { %s25_s13 = sshll.u32 %s680_s0, 4  ;;  %s543_s14 = smov [#allocation5]   ;;  %s26_s13 = int_to_ptr.hbm [resolvable:$true] %s25_s13 }
   0xb   :  { %s27_s15 = sshll.u32 %s543_s14, 4  ;;  %s51_s17 = sshll.u32 %s682_s2, 4  ;;  %s28_s15 = int_to_ptr.vmem [resolvable:$true] %s27_s15  ;;  %s52_s17 = int_to_ptr.hbm [resolvable:$true] %s51_s17 }
   0xc   :  { %33 = dma.hbm_to_vmem [thread:$0]  %s26_s13, 256, %s28_s15, [#allocation6], %s538_s25, %s538_s25, %s539_s26  }
   0xd   :  { %s544_s18 = smov [#allocation9]   ;;  %s77_s22 = sshll.u32 %s684_s4, 4  ;;  %s78_s22 = int_to_ptr.hbm [resolvable:$true] %s77_s22 }
   0xe   :  { %s53_s19 = sshll.u32 %s544_s18, 4  ;;  %s90_s24 = sshll.u32 %s685_s5, 4  ;;  %s54_s19 = int_to_ptr.vmem [resolvable:$true] %s53_s19  ;;  %s91_s24 = int_to_ptr.hbm [resolvable:$true] %s90_s24 }
   0xf   :  { %59 = dma.hbm_to_vmem [thread:$0]  %s52_s17, 256, %s54_s19, [#allocation8], %s538_s25, %s538_s25, %s539_s26  }
  0x10   :  { %s545_s27 = smov [#allocation12]   ;;  %s546_s2 = smov [#allocation13]  }
  0x11   :  { %s79_s28 = sshll.u32 %s545_s27, 4  ;;  %s92_s12 = sshll.u32 %s546_s2, 4  ;;  %s80_s28 = int_to_ptr.vmem [resolvable:$true] %s79_s28  ;;  %s93_s12 = int_to_ptr.vmem [resolvable:$true] %s92_s12 }
  0x12   :  { %85 = dma.hbm_to_vmem [thread:$0]  %s78_s22, 256, %s80_s28, [#allocation11], %s541_s29, %s541_s29, %s542_s30  }
  0x13   :  { %98 = dma.hbm_to_vmem [thread:$0]  %s91_s24, 256, %s93_s12, [#allocation14], %s541_s29, %s541_s29, %s542_s30  }
  0x14   :  { %529 = dma.done.wait [#allocation6], 256  }
  0x15   :  { %530 = vsyncadd [#allocation6], 4294967040 }
  0x16   :  { %531 = dma.done.wait [#allocation8], 512  }
  0x17   :  { %532 = vsyncadd [#allocation8], 4294966784 }
  0x18   :  { %533 = dma.done.wait [#allocation11], 512  }
  0x19   :  { %534 = vsyncadd [#allocation11], 4294966784 }
  0x1a   :  { %535 = dma.done.wait [#allocation14], 256  }
  0x1b   :  { %536 = vsyncadd [#allocation14], 4294967040  ;;  %vm134_vm0 = vcmask 261120   ;;  %v547_v0 = vmov 0.0   ;;  %v366_v1 = vld [vmem:[#allocation10 + $0x8] sm:$0xff]  ;;  %v368_v2 = vld [vmem:[#allocation12 + $0x8] sm:$0xff] }
  0x1c   :  { %135 = vst.msk [vmem:[#allocation2] sm:$0xff] %vm134_vm0, %v547_v0  ;;  %v370_v3 = vld [vmem:[#allocation13 + $0x8] sm:$0xff]  ;;  %v168_v4 = vsel %vm134_vm0, %v366_v1, 0  ;;  %v214_v5 = vsel %vm134_vm0, %v368_v2, 0  ;;  %v365_v7 = vld [vmem:[#allocation10] sm:$0xff]  ;;  %v367_v8 = vld [vmem:[#allocation12] sm:$0xff] }
  0x1d   :  { %136 = vst.msk [vmem:[#allocation2 + $0x8] sm:$0xff] %vm134_vm0, %v547_v0  ;;  %v260_v6 = vsel %vm134_vm0, %v370_v3, 0  ;;  %176 = vmatpush.bf16.xpose.msra.mxu0 %v168_v4  ;;  %222 = vmatpush.bf16.xpose.msra.mxu1 %v214_v5  ;;  %v369_v9 = vld [vmem:[#allocation13] sm:$0xff]  ;;  %v165_v10 = vsel %vm134_vm0, %v365_v7, 0  ;;  %v211_v11 = vsel %vm134_vm0, %v367_v8, 0  ;;  %v143_v13 = vld [vmem:[#allocation5] sm:$0xff] }
  0x1e   :  { %137 = vst.msk [vmem:[#allocation3] sm:$0xff] %vm134_vm0, %v547_v0  ;;  %268 = vmatpush.bf16.xpose.msra.mxu2 %v260_v6  ;;  %v257_v12 = vsel %vm134_vm0, %v369_v9, 0  ;;  %v144_v14 = vld [vmem:[#allocation5 + $0x8] sm:$0xff]  ;;  %v190_v15 = vld [vmem:[#allocation7] sm:$0xff]  ;;  %v191_v16 = vld [vmem:[#allocation7 + $0x8] sm:$0xff]  ;;  %vm295_vm1 = vcmask 257024  }
  0x1f   :  { %138 = vst.msk [vmem:[#allocation3 + $0x8] sm:$0xff] %vm134_vm0, %v547_v0  ;;  %v236_v17 = vld [vmem:[#allocation9] sm:$0xff]  ;;  %v237_v18 = vld [vmem:[#allocation9 + $0x8] sm:$0xff]  ;;  %v145_v19 = vpack.c.bf16 %v144_v14, %v143_v13  ;;  %v192_v20 = vpack.c.bf16 %v191_v16, %v190_v15  ;;  %v382_v31 = vld [vmem:[%s686_s6] ss:$0 sm:$0xff] }
  0x20   :  { %139 = vst.msk [vmem:[#allocation4] sm:$0xff] %vm134_vm0, %v547_v0  ;;  %v238_v21 = vpack.c.bf16 %v237_v18, %v236_v17  ;;  %v383_v33 = vld [vmem:[%s687_s7] ss:$0 sm:$0xff] }
  0x21   :  { %140 = vst.msk [vmem:[#allocation4 + $0x8] sm:$0xff] %vm134_vm0, %v547_v0  ;;  %v384_v46 = vld [vmem:[%s688_s8] ss:$0 sm:$0xff] }
  0x23   :  { %v141_v22 = vld [vmem:[#allocation2] sm:$0xff] }
  0x24   :  { %v142_v29 = vld [vmem:[#allocation2 + $0x8] sm:$0xff] }
  0x25   :  { %177 = vmatpush.bf16.xpose.msra.mxu0 %v165_v10  ;;  %223 = vmatpush.bf16.xpose.msra.mxu1 %v211_v11  ;;  %v188_v23 = vld [vmem:[#allocation3] sm:$0xff] }
  0x26   :  { %269 = vmatpush.bf16.xpose.msra.mxu2 %v257_v12  ;;  %v189_v30 = vld [vmem:[#allocation3 + $0x8] sm:$0xff] }
  0x27   :  { %v234_v28 = vld [vmem:[#allocation4] sm:$0xff] }
  0x28   :  { %v235_v44 = vld [vmem:[#allocation4 + $0x8] sm:$0xff] }
  0x2c   :  { %346 = vmatmul.msk.bf16.vlgmr.msra.gmra.mxu0 %vm134_vm0, %v145_v19  ;;  %355 = vmatmul.msk.bf16.vlgmr.msra.gmra.mxu1 %vm134_vm0, %v192_v20 }
  0x2d   :  { %364 = vmatmul.msk.bf16.vlgmr.msra.gmra.mxu2 %vm134_vm0, %v238_v21 }
  0xa9   :  { %v179_v24 = vpop.f32.mrf.mxu0  ;;  %v225_v25 = vpop.f32.mrf.mxu1 }
  0xaa   :  { %v184_v26 = vadd.f32 %v179_v24, %v141_v22  ;;  %v230_v27 = vadd.f32 %v225_v25, %v188_v23 }
  0xac   :  { %186 = vst.msk [vmem:[#allocation2] sm:$0xff] %vm134_vm0, %v184_v26 }
  0xad   :  { %232 = vst.msk [vmem:[#allocation3] sm:$0xff] %vm134_vm0, %v230_v27 }
  0xb0   :  { %v271_v32 = vpop.f32.mrf.mxu2 }
  0xb1   :  { %v276_v34 = vadd.f32 %v271_v32, %v234_v28  ;;  %v181_v35 = vpop.f32.mrf.mxu0  ;;  %v227_v36 = vpop.f32.mrf.mxu1 }
  0xb2   :  { %v185_v37 = vadd.f32 %v181_v35, %v142_v29  ;;  %v231_v38 = vadd.f32 %v227_v36, %v189_v30 }
  0xb3   :  { %v283_v39 = vld [vmem:[#allocation2] sm:$0xff]  ;;  %278 = vst.msk [vmem:[#allocation4] sm:$0xff] %vm134_vm0, %v276_v34 }
  0xb4   :  { %v289_v40 = vadd.f32 %v382_v31, %v283_v39  ;;  %v298_v41 = vld [vmem:[#allocation3] sm:$0xff]  ;;  %187 = vst.msk [vmem:[#allocation2 + $0x8] sm:$0xff] %vm134_vm0, %v185_v37 }
  0xb5   :  { %v304_v42 = vadd.f32 %v383_v33, %v298_v41  ;;  %233 = vst.msk [vmem:[#allocation3 + $0x8] sm:$0xff] %vm134_vm0, %v231_v38 }
  0xb6   :  { %v291_v43 = vmul.f32 0.35355338, %v289_v40 }
  0xb7   :  { %v306_v45 = vpack.c.bf16 %v304_v42, %v304_v42 }
  0xb8   :  { %v293_v47 = vpack.c.bf16 %v291_v43, %v291_v43  ;;  %v273_v48 = vpop.f32.mrf.mxu2 }
  0xb9   :  { %308 = vst.msk [vmem:[%s690_s10] sm:$0xf] %vm295_vm1, %v306_v45  ;;  %v277_v49 = vadd.f32 %v273_v48, %v235_v44 }
  0xba   :  { %296 = vst.msk [vmem:[%s689_s9] sm:$0xf] %vm295_vm1, %v293_v47  ;;  %v310_v50 = vld [vmem:[#allocation4] sm:$0xff] }
  0xbb   :  { %v316_v51 = vadd.f32 %v384_v46, %v310_v50  ;;  %v284_v52 = vld [vmem:[#allocation2 + $0x8] sm:$0xff]  ;;  %279 = vst.msk [vmem:[#allocation4 + $0x8] sm:$0xff] %vm134_vm0, %v277_v49 }
  0xbc   :  { %v290_v53 = vadd.f32 %v382_v31, %v284_v52  ;;  %v299_v54 = vld [vmem:[#allocation3 + $0x8] sm:$0xff] }
  0xbd   :  { %v318_v55 = vpack.c.bf16 %v316_v51, %v316_v51  ;;  %v305_v56 = vadd.f32 %v383_v33, %v299_v54 }
  0xbe   :  { %v292_v57 = vmul.f32 0.35355338, %v290_v53 }
  0xbf   :  { %320 = vst.msk [vmem:[%s691_s11] sm:$0xf] %vm295_vm1, %v318_v55  ;;  %v307_v58 = vpack.c.bf16 %v305_v56, %v305_v56 }
  0xc0   :  { %v294_v59 = vpack.c.bf16 %v292_v57, %v292_v57 }
  0xc1   :  { %309 = vst.msk [vmem:[%s690_s10 + $0x4] sm:$0xf] %vm295_vm1, %v307_v58 }
  0xc2   :  { %297 = vst.msk [vmem:[%s689_s9 + $0x4] sm:$0xf] %vm295_vm1, %v294_v59  ;;  %v311_v60 = vld [vmem:[#allocation4 + $0x8] sm:$0xff] }
  0xc3   :  { %v317_v61 = vadd.f32 %v384_v46, %v311_v60 }
  0xc5   :  { %v319_v62 = vpack.c.bf16 %v317_v61, %v317_v61 }
  0xc7   :  { %321 = vst.msk [vmem:[%s691_s11 + $0x4] sm:$0xf] %vm295_vm1, %v319_v62 }
  0xc8   :  { %334 = vsyncpa [#allocation6], 1 }
  0xc9   :  { %335 = vsyncpa [#allocation8], 1 }
  0xca   :  { %336 = vsyncpa [#allocation11], 1 }
  0xcb   :  { %337 = vsyncpa [#allocation14], 1 }

</bundles_post_ra>
